<compile_context>
chip_gen: v7x
topology: tpu7x:2x2x1
jax: 0.10.0
libtpu: 0.0.40
codegen_flags: <defaults>
</compile_context>

<pallas_src>
import functools

import jax
import jax.numpy as jnp
from jax import lax
from jax.experimental import pallas as pl
from jax.experimental.pallas import tpu as pltpu

_EPS = 1e-12              # torch.nn.functional.normalize default eps
_EPS_SQ = _EPS * _EPS
_LANE = 128
_SUBLANE = 8
_DEFAULT_VMEM_LIMIT = 48 * 1024 * 1024


def _round_up(n, m):
    return ((n + m - 1) // m) * m


def _inv_l2_norm(v):
    # 1 / max(||v||, eps) == rsqrt(max(||v||^2, eps^2)); exact rsqrt -> EUP.
    return lax.rsqrt(
        jnp.maximum(jnp.sum(v * v, axis=-1, keepdims=True), jnp.float32(_EPS_SQ))
    )


# ---------------------------------------------------------------------------
# Row L2-normalization (the F.normalize tail of FingerNet.forward) and the
# hoisted weight-normalization prologue.
# ---------------------------------------------------------------------------
def _l2_normalize_kernel(x_ref, o_ref):
    x = x_ref[...].astype(jnp.float32)
    o_ref[...] = (x * _inv_l2_norm(x)).astype(o_ref.dtype)


def _normalize_rows_padded(x, rows_p, cols_p, out_dtype, *,
                           tile_rows=1024,
                           vmem_limit_bytes=_DEFAULT_VMEM_LIMIT):
    """Pad `x` (zeros) to (rows_p, cols_p), L2-normalize each row, return the
    padded result in `out_dtype`.  Zero (padded) rows stay zero thanks to the
    eps clamp; zero (padded) columns do not perturb the norm."""
    r, c = x.shape
    xp = x if (r == rows_p and c == cols_p) else jnp.pad(
        x, ((0, rows_p - r), (0, cols_p - c)))

    if rows_p <= tile_rows:
        # Small: single VMEM block, no grid -> no per-step pipeline overhead.
        return pl.pallas_call(
            _l2_normalize_kernel,
            out_shape=jax.ShapeDtypeStruct((rows_p, cols_p), out_dtype),
            in_specs=[pl.BlockSpec(memory_space=pltpu.MemorySpace.VMEM)],
            out_specs=pl.BlockSpec(memory_space=pltpu.MemorySpace.VMEM),
        )(xp)

    grid = (pl.cdiv(rows_p, tile_rows),)
    return pl.pallas_call(
        _l2_normalize_kernel,
        out_shape=jax.ShapeDtypeStruct((rows_p, cols_p), out_dtype),
        grid=grid,
        in_specs=[pl.BlockSpec((tile_rows, cols_p), lambda i: (i, 0))],
        out_specs=pl.BlockSpec((tile_rows, cols_p), lambda i: (i, 0)),
        compiler_params=pltpu.CompilerParams(
            dimension_semantics=("parallel",),
            vmem_limit_bytes=vmem_limit_bytes),
    )(xp)


def l2_normalize_rows(x, *, tile_b=1024, out_dtype=None,
                      vmem_limit_bytes=_DEFAULT_VMEM_LIMIT):
    """Pallas equivalent of torch.nn.functional.normalize(x) (dim=1, eps=1e-12).

    Preserves the input dtype by default (matches torch).  Pads / slices only
    when the shape is not already (8, 128)-aligned.
    """
    # TODO(synk): for tiny (B, D) this op is better left to XLA fusion with the
    # producing matmul; it is kept as a Pallas kernel here because it is the
    # FingerNet tail being demonstrated and doubles as the weight-norm prologue.
    B, D = x.shape
    out_dtype = x.dtype if out_dtype is None else out_dtype
    Bp = _round_up(B, _SUBLANE)
    Dp = _round_up(D, _LANE)
    out = _normalize_rows_padded(x, Bp, Dp, out_dtype,
                                 tile_rows=tile_b,
                                 vmem_limit_bytes=vmem_limit_bytes)
    if Bp != B or Dp != D:
        out = out[:B, :D]
    return out


# ---------------------------------------------------------------------------
# Cosine-similarity classifier head: F.linear(F.normalize(x), F.normalize(w)).
# ---------------------------------------------------------------------------
def _cosine_linear_small_kernel(x_ref, w_ref, o_ref, *, compute_dtype):
    # x_ref: (Bp, Dp) native dtype; w_ref: (Np, Dp) pre-normalized compute_dtype.
    xf = x_ref[...].astype(jnp.float32)
    xn = (xf * _inv_l2_norm(xf)).astype(compute_dtype)
    # Contract the last (lane) axis of BOTH operands -> no w relayout; bf16 MXU
    # inputs with f32 accumulation.
    o_ref[...] = lax.dot_general(
        xn, w_ref[...],
        dimension_numbers=(((1,), (1,)), ((), ())),
        preferred_element_type=jnp.float32,
    ).astype(o_ref.dtype)


def _cosine_matmul_kernel(x_ref, w_ref, o_ref, xn_ref):
    # Grid = (row tiles i, column tiles j); j is innermost ("arbitrary").
    # Normalize the x row-block once per row tile and cache it (compute dtype)
    # in VMEM scratch; every N tile then reuses it -> pure MXU inner loop.
    @pl.when(pl.program_id(1) == 0)
    def _():
        xf = x_ref[...].astype(jnp.float32)
        xn_ref[...] = (xf * _inv_l2_norm(xf)).astype(xn_ref.dtype)

    o_ref[...] = lax.dot_general(
        xn_ref[...], w_ref[...],
        dimension_numbers=(((1,), (1,)), ((), ())),
        preferred_element_type=jnp.float32,
    ).astype(o_ref.dtype)


def finger_cosine_linear(x, weight, *, weight_is_normalized=False,
                         compute_dtype=jnp.bfloat16, out_dtype=jnp.float32,
                         tile_b=512, tile_n=1024,
                         vmem_limit_bytes=_DEFAULT_VMEM_LIMIT):
    """out = F.linear(F.normalize(x), F.normalize(weight)) -> (B, n_ids).

    `weight_is_normalized=True` skips the (already hoisted, once-per-call)
    weight row-normalization entirely -- pass `l2_normalize_rows(weight)` once
    and reuse it across calls.
    """
    B, D = x.shape
    N, Dw = weight.shape
    assert D == Dw, "feature dims must match"

    Bp = _round_up(B, _SUBLANE)
    Dp = _round_up(D, _LANE)
    Np = _round_up(N, _LANE)

    # Weight: normalized once per call (outside the grid), padded lane-dense,
    # stored in compute_dtype (bf16 halves the resident VMEM / HBM DMA bytes).
    if weight_is_normalized:
        wp = weight if (N == Np and D == Dp) else jnp.pad(
            weight, ((0, Np - N), (0, Dp - D)))
        wp = wp.astype(compute_dtype)
    else:
        wp = _normalize_rows_padded(weight, Np, Dp, compute_dtype,
                                    tile_rows=max(tile_n, _LANE),
                                    vmem_limit_bytes=vmem_limit_bytes)

    # x streams in its NATIVE dtype (upcast happens inside the kernel); pad
    # only when the shape is not already sublane/lane aligned.
    xp = x if (B == Bp and D == Dp) else jnp.pad(x, ((0, Bp - B), (0, Dp - D)))

    if Bp <= tile_b and Np <= tile_n:
        # Small problem: single VMEM block, gridless -> no pipeline overhead,
        # no double buffering (subsumes the Buffered(1) suggestion).
        out = pl.pallas_call(
            functools.partial(_cosine_linear_small_kernel,
                              compute_dtype=compute_dtype),
            out_shape=jax.ShapeDtypeStruct((Bp, Np), out_dtype),
            in_specs=[pl.BlockSpec(memory_space=pltpu.MemorySpace.VMEM),
                      pl.BlockSpec(memory_space=pltpu.MemorySpace.VMEM)],
            out_specs=pl.BlockSpec(memory_space=pltpu.MemorySpace.VMEM),
        )(xp, wp)
    else:
        # Tiled path: (B, N) grid.  B is padded only to a sublane multiple and
        # the grid uses cdiv (no full-tile padding).  The batch axis is
        # "parallel" (megacore / v7x dual TC); the N axis is "arbitrary" so the
        # normalized-x scratch computed at j == 0 stays valid for all j.
        tb = min(tile_b, Bp)
        tn = min(tile_n, Np)
        grid = (pl.cdiv(Bp, tb), pl.cdiv(Np, tn))
        out = pl.pallas_call(
            _cosine_matmul_kernel,
            out_shape=jax.ShapeDtypeStruct((Bp, Np), out_dtype),
            grid=grid,
            in_specs=[pl.BlockSpec((tb, Dp), lambda i, j: (i, 0)),
                      pl.BlockSpec((tn, Dp), lambda i, j: (j, 0))],
            out_specs=pl.BlockSpec((tb, tn), lambda i, j: (i, j)),
            scratch_shapes=[pltpu.VMEM((tb, Dp), compute_dtype)],
            compiler_params=pltpu.CompilerParams(
                dimension_semantics=("parallel", "arbitrary"),
                vmem_limit_bytes=vmem_limit_bytes),
        )(xp, wp)

    if Bp != B or Np != N:
        out = out[:B, :N]
    return out


def finger_cosine_linear_ref(x, weight, eps=_EPS):
    """Pure-JAX reference matching torch.nn.functional semantics (f32)."""
    x = x.astype(jnp.float32)
    weight = weight.astype(jnp.float32)
    xn = x / jnp.maximum(jnp.linalg.norm(x, axis=-1, keepdims=True), eps)
    wn = weight / jnp.maximum(jnp.linalg.norm(weight, axis=-1, keepdims=True), eps)
    return xn @ wn.T


if __name__ == "__main__":
    key = jax.random.PRNGKey(0)
    kx, kw, kx2 = jax.random.split(key, 3)

    n_ids, n_dim, batch = 32, 16, 8
    weight = 0.01 * jax.random.normal(kw, (n_ids, n_dim), dtype=jnp.float32)
    x = jax.random.normal(kx, (batch, n_dim), dtype=jnp.float32)
    ref = finger_cosine_linear_ref(x, weight)

    # 1) Small batch -> gridless single-block kernel, f32 MXU path (exact).
    out_f32 = jax.block_until_ready(
        finger_cosine_linear(x, weight, compute_dtype=jnp.float32))
    assert out_f32.shape == (batch, n_ids)
    assert jnp.allclose(out_f32, ref, atol=1e-5, rtol=1e-5), "f32 cosine-linear mismatch"

    # 2) Same, default bf16 MXU inputs (f32 accumulation) -> looser tolerance.
    out_bf16 = jax.block_until_ready(finger_cosine_linear(x, weight))
    assert jnp.allclose(out_bf16, ref, atol=3e-2, rtol=3e-2), "bf16 cosine-linear mismatch"

    # 3) Plain F.normalize tail (FingerNet.forward's final op), dtype-preserving.
    xn = jax.block_until_ready(l2_normalize_rows(x))
    xn_ref = x / jnp.maximum(jnp.linalg.norm(x, axis=-1, keepdims=True), _EPS)
    assert xn.dtype == x.dtype
    assert jnp.allclose(xn, xn_ref, atol=1e-5, rtol=1e-5), "normalize mismatch"
    x_bf16 = x.astype(jnp.bfloat16)
    xn_bf16 = jax.block_until_ready(l2_normalize_rows(x_bf16))
    assert xn_bf16.dtype == jnp.bfloat16
    xn_bf16_ref = finger_cosine_linear_ref(x_bf16, jnp.eye(n_dim, dtype=jnp.float32))
    assert jnp.allclose(xn_bf16.astype(jnp.float32), xn_bf16_ref, atol=1e-2), \
        "bf16 normalize mismatch"

    # 4) Larger problem -> (B, N)-tiled path with native-bf16 activations and
    #    the weight normalization hoisted out entirely (normalized once, reused).
    big_b, big_ids, emb = 512, 256, 96
    xb = jax.random.normal(kx2, (big_b, emb), dtype=jnp.bfloat16)
    wb = 0.01 * jax.random.normal(kw, (big_ids, emb), dtype=jnp.float32)
    w_norm = l2_normalize_rows(wb)                     # hoisted, reusable
    out_big = jax.block_until_ready(
        finger_cosine_linear(xb, w_norm, weight_is_normalized=True,
                             tile_b=128, tile_n=128))
    ref_big = finger_cosine_linear_ref(xb, wb)
    assert out_big.shape == (big_b, big_ids)
    assert jnp.allclose(out_big, ref_big, atol=3e-2, rtol=3e-2), "tiled mismatch"

    print("KERNEL_OK")
</pallas_src>

<mosaic_0001>
module attributes {stable_mosaic.version = 11 : i64} {
  func.func @_l2_normalize_kernel(%arg0: memref<128x128xf32, #tpu.memory_space<vmem>>, %arg1: memref<128x128xf32, #tpu.memory_space<vmem>>) attributes {dimension_semantics = [], scalar_prefetch = 0 : i64, scratch_operands = 0 : i64, tpu.core_type = #tpu.core_type<tc>} {
    %c0 = arith.constant 0 : index
    %c0_0 = arith.constant 0 : index
    %0 = vector.load %arg0[%c0, %c0_0] : memref<128x128xf32, #tpu.memory_space<vmem>>, vector<128x128xf32>
    %1 = arith.mulf %0, %0 : vector<128x128xf32>
    %cst = arith.constant dense<0.000000e+00> : vector<128xf32>
    %2 = vector.multi_reduction <add>, %1, %cst [1] : vector<128x128xf32> to vector<128xf32>
    %3 = vector.shape_cast %2 : vector<128xf32> to vector<128x1xf32>
    %cst_1 = arith.constant 1.000000e-24 : f32
    %4 = vector.broadcast %cst_1 : f32 to vector<128x1xf32>
    %5 = arith.maximumf %3, %4 : vector<128x1xf32>
    %6 = math.rsqrt %5 : vector<128x1xf32>
    %7 = vector.broadcast %6 : vector<128x1xf32> to vector<128x128xf32>
    %8 = arith.mulf %0, %7 : vector<128x128xf32>
    %c0_2 = arith.constant 0 : index
    %c0_3 = arith.constant 0 : index
    %9 = vector.load %arg1[%c0_2, %c0_3] : memref<128x128xf32, #tpu.memory_space<vmem>>, vector<128x128xf32>
    tpu.vector_store %arg1[%c0_2, %c0_3], %8 {strides = array<i32>} : memref<128x128xf32, #tpu.memory_space<vmem>>, vector<128x128xf32>,
    return
  }
}

</mosaic_0001>

<bundles_post_ra>
// kernel: tpu_custom_call.1
= control target key start
LH: loop header
LB: loop body
LE: loop exit
PB: predicated region body
PF: predicated region fallthrough
CT: control target
= control target key end

     0   :  { %6 = vsyncpa [#allocation3], 0  ;;  %s376_s0 = inlined_call_operand.hbm [shape: f32[128,128], index: 0, kind: input, shape index: {}]   ;;  %s377_s1 = inlined_call_operand.hbm [shape: f32[128,128], index: 1, kind: output, shape index: {}]  }
   0x1   :  { %7 = vsyncpa [#allocation4], 0  ;;  %s252_s6 = smov [#allocation2]   ;;  %s204_s10 = scalar_lea.hbm %s376_s0, 2048 }
   0x2   :  { %s13_s7 = sshll.u32 %s252_s6, 4  ;;  %p205_p0 = scmp.ne.s32.totalorder %s376_s0, %s204_s10  ;;  %s14_s7 = int_to_ptr.vmem [resolvable:$true] %s13_s7 }
   0x3   :  { %p208_p1 = scmp.lt.u32.totalorder %s204_s10, %s376_s0 }
   0x5   :  { %p210_p2 = pnand %p208_p1, %p205_p0 }
   0x7   :  { %213 = shalt.err (!%p210_p2)
}
   0x8   :  { %s214_s15 = scalar_lea.vmem %s14_s7, 2048  ;;  %p219_p4 = scmp.lt.s32.totalorder %s14_s7, %s14_s7 }
   0x9   :  { %p215_p3 = scmp.ne.s32.totalorder %s14_s7, %s214_s15  ;;  %p220_p5 = scmp.lt.s32.totalorder %s214_s15, %s214_s15 }
   0xb   :  { %p221_p6 = por %p220_p5, %p219_p4 }
   0xd   :  { %p222_p7 = pnand %p221_p6, %p215_p3 }
   0xf   :  { %225 = shalt.err (!%p222_p7)
}
  0x10   :  { %s253_s16 = smov 128   ;;  %s254_s17 = smov 8  }
  0x11   :  { %19 = dma.hbm_to_vmem [thread:$0]  %s376_s0, 2048, %s14_s7, [#allocation3], %s253_s16, %s253_s16, %s254_s17  }
  0x12   :  { %248 = dma.done.wait [#allocation3], 2048  }
  0x13   :  { %249 = vsyncadd [#allocation3], 4294965248  ;;  %v281_v0 = vld [vmem:[#allocation2 + $0x10] sm:$0xff]  ;;  %v283_v1 = vld [vmem:[#allocation2] sm:$0xff]  ;;  %s255_s0 = smov [#allocation5]  }
  0x14   :  { %v285_v2 = vld [vmem:[#allocation2 + $0x18] sm:$0xff]  ;;  %v41_v3 = vmul.f32 %v281_v0, %v281_v0  ;;  %v39_v4 = vmul.f32 %v283_v1, %v283_v1  ;;  %v291_v5 = vld [vmem:[#allocation2 + $0x8] sm:$0xff]  ;;  %v299_v9 = vld [vmem:[#allocation2 + $0x20] sm:$0xff]  ;;  %s156_s20 = sshll.u32 %s255_s0, 4  ;;  %s157_s20 = int_to_ptr.vmem [resolvable:$true] %s156_s20 }
  0x15   :  { %v42_v6 = vmul.f32 %v285_v2, %v285_v2  ;;  %v40_v7 = vmul.f32 %v291_v5, %v291_v5  ;;  %v297_v8 = vld [vmem:[#allocation2 + $0x28] sm:$0xff]  ;;  %v43_v11 = vmul.f32 %v299_v9, %v299_v9  ;;  %v305_v12 = vld [vmem:[#allocation2 + $0x38] sm:$0xff]  ;;  %v307_v13 = vld [vmem:[#allocation2 + $0x30] sm:$0xff]  ;;  %s226_s21 = scalar_lea.vmem %s157_s20, 2048  ;;  %p231_p9 = scmp.lt.s32.totalorder %s157_s20, %s157_s20 }
  0x16   :  { %59 = vadd.xlane.f32.xlu1 %v41_v3  ;;  %55 = vadd.xlane.f32.xlu0 %v39_v4  ;;  %v44_v10 = vmul.f32 %v297_v8, %v297_v8  ;;  %v46_v14 = vmul.f32 %v305_v12, %v305_v12  ;;  %v45_v15 = vmul.f32 %v307_v13, %v307_v13  ;;  %v313_v16 = vld [vmem:[#allocation2 + $0x48] sm:$0xff]  ;;  %v315_v17 = vld [vmem:[#allocation2 + $0x40] sm:$0xff]  ;;  %v321_v20 = vld [vmem:[#allocation2 + $0x58] sm:$0xff]  ;;  %p227_p8 = scmp.ne.s32.totalorder %s157_s20, %s226_s21  ;;  %p232_p10 = scmp.lt.s32.totalorder %s226_s21, %s226_s21 }
  0x17   :  { %v48_v18 = vmul.f32 %v313_v16, %v313_v16  ;;  %v47_v19 = vmul.f32 %v315_v17, %v315_v17  ;;  %v323_v21 = vld [vmem:[#allocation2 + $0x50] sm:$0xff]  ;;  %v50_v22 = vmul.f32 %v321_v20, %v321_v20  ;;  %v329_v24 = vld [vmem:[#allocation2 + $0x68] sm:$0xff]  ;;  %v331_v25 = vld [vmem:[#allocation2 + $0x60] sm:$0xff] }
  0x18   :  { %v49_v23 = vmul.f32 %v323_v21, %v323_v21  ;;  %v52_v26 = vmul.f32 %v329_v24, %v329_v24  ;;  %v51_v27 = vmul.f32 %v331_v25, %v331_v25  ;;  %v337_v28 = vld [vmem:[#allocation2 + $0x78] sm:$0xff]  ;;  %v339_v29 = vld [vmem:[#allocation2 + $0x70] sm:$0xff]  ;;  %p233_p11 = por %p232_p10, %p231_p9 }
  0x19   :  { %v54_v30 = vmul.f32 %v337_v28, %v337_v28  ;;  %v53_v31 = vmul.f32 %v339_v29, %v339_v29 }
  0x1a   :  { %61 = vadd.xlane.f32.xlu1 %v42_v6  ;;  %57 = vadd.xlane.f32.xlu0 %v40_v7  ;;  %p234_p12 = pnand %p233_p11, %p227_p8 }
  0x1e   :  { %65 = vadd.xlane.f32.xlu1 %v44_v10  ;;  %63 = vadd.xlane.f32.xlu0 %v43_v11 }
  0x22   :  { %69 = vadd.xlane.f32.xlu1 %v46_v14  ;;  %67 = vadd.xlane.f32.xlu0 %v45_v15 }
  0x26   :  { %73 = vadd.xlane.f32.xlu1 %v48_v18  ;;  %71 = vadd.xlane.f32.xlu0 %v47_v19 }
  0x2a   :  { %77 = vadd.xlane.f32.xlu1 %v50_v22  ;;  %75 = vadd.xlane.f32.xlu0 %v49_v23 }
  0x2e   :  { %81 = vadd.xlane.f32.xlu1 %v52_v26  ;;  %79 = vadd.xlane.f32.xlu0 %v51_v27 }
  0x32   :  { %85 = vadd.xlane.f32.xlu1 %v54_v30  ;;  %83 = vadd.xlane.f32.xlu0 %v53_v31 }
  0xa3   :  { %v60_v32 = vpop.xlane.xlu1 %59  ;;  %v56_v33 = vpop.xlane.xlu0 %55 }
  0xa4   :  { %v89_v34 = vmax.f32 %v60_v32, 1e-24  ;;  %v87_v35 = vmax.f32 %v56_v33, 1e-24 }
  0xa6   :  { %172 = vrsqrt.f32 %v89_v34 }
  0xa7   :  { %174 = vrsqrt.f32 %v87_v35  ;;  %v62_v36 = vpop.xlane.xlu1 %61  ;;  %v58_v37 = vpop.xlane.xlu0 %57 }
  0xa8   :  { %v90_v38 = vmax.f32 %v62_v36, 1e-24  ;;  %v88_v39 = vmax.f32 %v58_v37, 1e-24 }
  0xaa   :  { %176 = vrsqrt.f32 %v90_v38 }
  0xab   :  { %178 = vrsqrt.f32 %v88_v39  ;;  %v66_v40 = vpop.xlane.xlu1 %65  ;;  %v64_v41 = vpop.xlane.xlu0 %63 }
  0xac   :  { %v92_v42 = vmax.f32 %v66_v40, 1e-24  ;;  %v91_v43 = vmax.f32 %v64_v41, 1e-24 }
  0xae   :  { %180 = vrsqrt.f32 %v92_v42 }
  0xaf   :  { %182 = vrsqrt.f32 %v91_v43  ;;  %v70_v44 = vpop.xlane.xlu1 %69  ;;  %v68_v45 = vpop.xlane.xlu0 %67 }
  0xb0   :  { %v173_v46 = vpop.eup %172  ;;  %v94_v47 = vmax.f32 %v70_v44, 1e-24  ;;  %v93_v48 = vmax.f32 %v68_v45, 1e-24 }
  0xb1   :  { %v175_v49 = vpop.eup %174  ;;  %v121_v50 = vmul.f32 %v173_v46, %v281_v0 }
  0xb2   :  { %v119_v51 = vmul.f32 %v175_v49, %v283_v1  ;;  %184 = vrsqrt.f32 %v94_v47 }
  0xb3   :  { %137 = vst [vmem:[#allocation5 + $0x10] sm:$0xff] %v121_v50  ;;  %186 = vrsqrt.f32 %v93_v48  ;;  %v74_v52 = vpop.xlane.xlu1 %73  ;;  %v72_v53 = vpop.xlane.xlu0 %71 }
  0xb4   :  { %v177_v54 = vpop.eup %176  ;;  %135 = vst [vmem:[#allocation5] sm:$0xff] %v119_v51  ;;  %v96_v55 = vmax.f32 %v74_v52, 1e-24  ;;  %v95_v56 = vmax.f32 %v72_v53, 1e-24 }
  0xb5   :  { %v179_v57 = vpop.eup %178  ;;  %v122_v58 = vmul.f32 %v177_v54, %v285_v2 }
  0xb6   :  { %v120_v59 = vmul.f32 %v179_v57, %v291_v5  ;;  %188 = vrsqrt.f32 %v96_v55 }
  0xb7   :  { %138 = vst [vmem:[#allocation5 + $0x18] sm:$0xff] %v122_v58  ;;  %190 = vrsqrt.f32 %v95_v56  ;;  %v78_v60 = vpop.xlane.xlu1 %77  ;;  %v76_v61 = vpop.xlane.xlu0 %75 }
  0xb8   :  { %v181_v62 = vpop.eup %180  ;;  %136 = vst [vmem:[#allocation5 + $0x8] sm:$0xff] %v120_v59  ;;  %v98_v63 = vmax.f32 %v78_v60, 1e-24  ;;  %v97_v0 = vmax.f32 %v76_v61, 1e-24 }
  0xb9   :  { %v183_v1 = vpop.eup %182  ;;  %v124_v3 = vmul.f32 %v181_v62, %v297_v8 }
  0xba   :  { %v123_v4 = vmul.f32 %v183_v1, %v299_v9  ;;  %192 = vrsqrt.f32 %v98_v63 }
  0xbb   :  { %140 = vst [vmem:[#allocation5 + $0x28] sm:$0xff] %v124_v3  ;;  %194 = vrsqrt.f32 %v97_v0  ;;  %v82_v2 = vpop.xlane.xlu1 %81  ;;  %v80_v6 = vpop.xlane.xlu0 %79 }
  0xbc   :  { %v185_v5 = vpop.eup %184  ;;  %139 = vst [vmem:[#allocation5 + $0x20] sm:$0xff] %v123_v4  ;;  %v100_v7 = vmax.f32 %v82_v2, 1e-24  ;;  %v99_v10 = vmax.f32 %v80_v6, 1e-24 }
  0xbd   :  { %v187_v11 = vpop.eup %186  ;;  %v126_v14 = vmul.f32 %v185_v5, %v305_v12 }
  0xbe   :  { %v125_v15 = vmul.f32 %v187_v11, %v307_v13  ;;  %196 = vrsqrt.f32 %v100_v7 }
  0xbf   :  { %142 = vst [vmem:[#allocation5 + $0x38] sm:$0xff] %v126_v14  ;;  %198 = vrsqrt.f32 %v99_v10  ;;  %v86_v8 = vpop.xlane.xlu1 %85  ;;  %v84_v18 = vpop.xlane.xlu0 %83 }
  0xc0   :  { %v189_v9 = vpop.eup %188  ;;  %141 = vst [vmem:[#allocation5 + $0x30] sm:$0xff] %v125_v15  ;;  %v102_v19 = vmax.f32 %v86_v8, 1e-24  ;;  %v101_v22 = vmax.f32 %v84_v18, 1e-24 }
  0xc1   :  { %v191_v23 = vpop.eup %190  ;;  %v128_v26 = vmul.f32 %v189_v9, %v313_v16 }
  0xc2   :  { %v127_v27 = vmul.f32 %v191_v23, %v315_v17  ;;  %200 = vrsqrt.f32 %v102_v19 }
  0xc3   :  { %144 = vst [vmem:[#allocation5 + $0x48] sm:$0xff] %v128_v26  ;;  %202 = vrsqrt.f32 %v101_v22 }
  0xc4   :  { %v193_v12 = vpop.eup %192  ;;  %143 = vst [vmem:[#allocation5 + $0x40] sm:$0xff] %v127_v27 }
  0xc5   :  { %v195_v13 = vpop.eup %194  ;;  %v130_v30 = vmul.f32 %v193_v12, %v321_v20 }
  0xc6   :  { %v129_v31 = vmul.f32 %v195_v13, %v323_v21 }
  0xc7   :  { %146 = vst [vmem:[#allocation5 + $0x58] sm:$0xff] %v130_v30 }
  0xc8   :  { %v197_v32 = vpop.eup %196  ;;  %145 = vst [vmem:[#allocation5 + $0x50] sm:$0xff] %v129_v31 }
  0xc9   :  { %v199_v33 = vpop.eup %198  ;;  %v132_v34 = vmul.f32 %v197_v32, %v329_v24 }
  0xca   :  { %v131_v16 = vmul.f32 %v199_v33, %v331_v25 }
  0xcb   :  { %148 = vst [vmem:[#allocation5 + $0x68] sm:$0xff] %v132_v34 }
  0xcc   :  { %v201_v17 = vpop.eup %200  ;;  %147 = vst [vmem:[#allocation5 + $0x60] sm:$0xff] %v131_v16 }
  0xcd   :  { %v203_v35 = vpop.eup %202  ;;  %v134_v36 = vmul.f32 %v201_v17, %v337_v28 }
  0xce   :  { %v133_v20 = vmul.f32 %v203_v35, %v339_v29 }
  0xcf   :  { %150 = vst [vmem:[#allocation5 + $0x78] sm:$0xff] %v134_v36 }
  0xd0   :  { %149 = vst [vmem:[#allocation5 + $0x70] sm:$0xff] %v133_v20 }
  0xd1   :  { %237 = shalt.err (!%p234_p12)
}
  0xd2   :  { %s238_s24 = scalar_lea.hbm %s377_s1, 2048 }
  0xd3   :  { %p239_p13 = scmp.ne.s32.totalorder %s377_s1, %s238_s24  ;;  %p242_p0 = scmp.lt.u32.totalorder %s238_s24, %s377_s1 }
  0xd5   :  { %p244_p1 = pnand %p242_p0, %p239_p13 }
  0xd7   :  { %247 = shalt.err (!%p244_p1)
}
  0xd8   :  { %162 = dma.vmem_to_hbm [thread:$0]  %s157_s20, 2048, %s377_s1, [#allocation4], %s253_s16, %s253_s16, %s254_s17  }
  0xd9   :  { %250 = dma.done.wait [#allocation4], 2048  }
  0xda   :  { %251 = vsyncadd [#allocation4], 4294965248 }
  0xdb   :  { %166 = vsyncpa [#allocation3], 1 }
  0xdc   :  { %167 = vsyncpa [#allocation4], 1 }

</bundles_post_ra>
